<compile_context>
chip_gen: v5e
topology: v5e:2x2
jax: 0.10.0
libtpu: 0.0.40
codegen_flags: <defaults>
</compile_context>

<pallas_src>
import functools

import jax
import jax.numpy as jnp
from jax.experimental import pallas as pl
from jax.experimental.pallas import tpu as pltpu


TN = 512  # class-tile for the FC head (multiple of 128, >=2 blocks for 1001 classes)


# ----------------------------------------------------------------------------
# One-time parameter preparation (hoisted out of the per-call path).
# ----------------------------------------------------------------------------
def prepare_params(w_conv, bn_scale, bn_bias, w_fc, b_fc, num_classes):
    cout, cin, kh, kw = w_conv.shape
    cout_pad = ((cout + 127) // 128) * 128
    # (Cout,Cin,KH,KW) -> (KH,KW,Cin,Cout) -> (KH*KW*Cin, Cout), matches im2col order
    w2 = jnp.transpose(w_conv, (2, 3, 1, 0)).reshape(kh * kw * cin, cout)
    w2_pad = jnp.zeros((kh * kw * cin, cout_pad), jnp.float32).at[:, :cout].set(w2)
    scale_pad = jnp.zeros((1, cout_pad), jnp.float32).at[:, :cout].set(bn_scale[None, :])
    bias_pad = jnp.zeros((1, cout_pad), jnp.float32).at[:, :cout].set(bn_bias[None, :])

    c = w_fc.shape[1]
    n_pad = ((num_classes + TN - 1) // TN) * TN
    # bf16 weight streaming (memory-bound head), f32 accumulation in-kernel.
    wt_pad = jnp.zeros((c, n_pad), jnp.bfloat16).at[:, :num_classes].set(
        w_fc.T.astype(jnp.bfloat16))
    bt_pad = jnp.zeros((1, n_pad), jnp.float32).at[:, :num_classes].set(b_fc[None, :])
    return {"w2_pad": w2_pad, "scale_pad": scale_pad, "bias_pad": bias_pad,
            "wt_pad": wt_pad, "bt_pad": bt_pad}


# ----------------------------------------------------------------------------
# Kernel 1: conv_0 = Conv2d(3, 96, k=3, s=2, bias=False) + BatchNorm2d(96)
# im2col matmul with BN folded into a per-channel scale/bias.
# ----------------------------------------------------------------------------
def conv_bn_kernel(p_ref, w_ref, scale_ref, bias_ref, o_ref):
    acc = jnp.dot(p_ref[...], w_ref[...], preferred_element_type=jnp.float32)
    o_ref[...] = acc * scale_ref[...] + bias_ref[...]


def _im2col(x_nhwc, k=3, s=2):
    n, h, w, c = x_nhwc.shape
    oh = (h - k) // s + 1
    ow = (w - k) // s + 1
    taps = []
    for kh in range(k):
        for kw in range(k):
            taps.append(x_nhwc[:, kh:kh + s * oh:s, kw:kw + s * ow:s, :])
    p = jnp.stack(taps, axis=3)                      # (N, OH, OW, k*k, C)
    return p.reshape(n * oh * ow, k * k * c), (n, oh, ow)


def conv0_bn(x_nchw, w2_pad, scale_pad, bias_pad, cout):
    """x: (N,3,H,W) -> (N,cout,OH,OW), matching PyTorch conv_0 semantics."""
    x_nhwc = jnp.transpose(x_nchw, (0, 2, 3, 1))
    patches, (n, oh, ow) = _im2col(x_nhwc, k=3, s=2)
    cout_pad = w2_pad.shape[1]

    out = pl.pallas_call(
        conv_bn_kernel,
        out_shape=jax.ShapeDtypeStruct((patches.shape[0], cout_pad), jnp.float32),
    )(patches, w2_pad, scale_pad, bias_pad)

    out = out[:, :cout].reshape(n, oh, ow, cout)
    return jnp.transpose(out, (0, 3, 1, 2))          # back to NCHW


# ----------------------------------------------------------------------------
# Kernel 2: ReLU + AvgPool2d(11, stride=1, padding=0) over an 11x11 feature
# map (== mean over all spatial positions).  Works on the free (N*C, H*W)
# view of the NCHW tensor (no XLA transpose), gridded over row tiles.
# Outputs bf16 so the FC matmul consumes a native bf16 activation.
# ----------------------------------------------------------------------------
def relu_pool_kernel(x_ref, o_ref):
    x = jnp.maximum(x_ref[...], 0.0)                     # (rt, HW) f32
    o_ref[...] = jnp.mean(x, axis=-1, keepdims=True).astype(o_ref.dtype)


def _largest_row_tile(rows, max_rows=2560, mult=16):
    best = rows                                          # full extent fallback
    for t in range(mult, max_rows + 1, mult):
        if rows % t == 0:
            best = t
    return best


def relu_avgpool(feat_nchw):
    n, c, h, w = feat_nchw.shape
    rows, hw = n * c, h * w
    x2d = feat_nchw.reshape(rows, hw)                    # free view, NO transpose
    rt = _largest_row_tile(rows)

    pooled = pl.pallas_call(
        relu_pool_kernel,
        out_shape=jax.ShapeDtypeStruct((rows, 1), jnp.bfloat16),
        grid_spec=pltpu.PrefetchScalarGridSpec(
            num_scalar_prefetch=0,
            grid=(rows // rt,),
            in_specs=[pl.BlockSpec((rt, hw), lambda i: (i, 0))],
            out_specs=pl.BlockSpec((rt, 1), lambda i: (i, 0)),
        ),
        compiler_params=pltpu.CompilerParams(
            dimension_semantics=("parallel",)),
    )(x2d)
    return pooled.reshape(n, c)                          # (N, C) bf16, free view


# ----------------------------------------------------------------------------
# Kernel 3: last_linear (4320 -> num_classes), bf16 weight streaming in
# 512-class tiles, f32 accumulation, padded classes sliced off.
# ----------------------------------------------------------------------------
def linear_kernel(p_ref, w_ref, b_ref, o_ref):
    o_ref[...] = (
        jnp.dot(p_ref[...], w_ref[...], preferred_element_type=jnp.float32)
        + b_ref[...]
    )


def last_linear(pooled_bf16, wt_pad, bt_pad, num_classes):
    n, c = pooled_bf16.shape
    n_pad = wt_pad.shape[1]
    out = pl.pallas_call(
        linear_kernel,
        out_shape=jax.ShapeDtypeStruct((n, n_pad), jnp.float32),
        grid_spec=pltpu.PrefetchScalarGridSpec(
            num_scalar_prefetch=0,
            grid=(n_pad // TN,),
            in_specs=[
                pl.BlockSpec((n, c), lambda j: (0, 0)),
                pl.BlockSpec((c, TN), lambda j: (0, j)),
                pl.BlockSpec((1, TN), lambda j: (0, j)),
            ],
            out_specs=pl.BlockSpec((n, TN), lambda j: (0, j)),
        ),
        compiler_params=pltpu.CompilerParams(
            dimension_semantics=("parallel",),
            vmem_limit_bytes=32 * 1024 * 1024),
    )(pooled_bf16, wt_pad, bt_pad)
    return out[:, :num_classes]


# ----------------------------------------------------------------------------
# Head (logits) = relu -> avg_pool(11) -> flatten -> dropout(eval) -> linear
# ----------------------------------------------------------------------------
def logits_head(feat_nchw, wt_pad, bt_pad, *, num_classes):
    pooled = relu_avgpool(feat_nchw)          # (N, 4320) bf16
    # dropout: identity in eval mode
    return last_linear(pooled, wt_pad, bt_pad, num_classes)


# ----------------------------------------------------------------------------
# Driver with deterministic synthetic parameters.
# ----------------------------------------------------------------------------
if __name__ == "__main__":
    key = jax.random.PRNGKey(0)
    ks = jax.random.split(key, 10)

    N = 2
    NUM_CLASSES = 1001
    FEAT_C, FEAT_HW = 4320, 11   # shape the logits head expects in PNASNet

    # --- inputs -------------------------------------------------------------
    x = jax.random.normal(ks[0], (N, 3, 16, 16), jnp.float32)
    feat = jax.random.normal(ks[1], (N, FEAT_C, FEAT_HW, FEAT_HW), jnp.float32)

    # --- conv_0 params (Conv2d(3,96,3,s=2,bias=False) + BatchNorm2d(96)) -----
    w_conv = 0.1 * jax.random.normal(ks[2], (96, 3, 3, 3), jnp.float32)
    gamma = 1.0 + 0.05 * jax.random.normal(ks[3], (96,), jnp.float32)
    beta = 0.05 * jax.random.normal(ks[4], (96,), jnp.float32)
    run_mean = 0.05 * jax.random.normal(ks[5], (96,), jnp.float32)
    run_var = jnp.abs(1.0 + 0.05 * jax.random.normal(ks[6], (96,), jnp.float32))
    eps = 1e-3
    bn_scale = gamma / jnp.sqrt(run_var + eps)
    bn_bias = beta - run_mean * bn_scale

    # --- last_linear params (4320 -> 1001) -----------------------------------
    w_fc = 0.02 * jax.random.normal(ks[7], (NUM_CLASSES, FEAT_C), jnp.float32)
    b_fc = 0.02 * jax.random.normal(ks[8], (NUM_CLASSES,), jnp.float32)

    # --- one-time parameter prep (pad/transpose/bf16 cast, hoisted) ----------
    params = prepare_params(w_conv, bn_scale, bn_bias, w_fc, b_fc, NUM_CLASSES)
    params = jax.block_until_ready(params)

    # --- run Pallas kernels ---------------------------------------------------
    conv_fn = jax.jit(functools.partial(conv0_bn, cout=96))
    head_fn = jax.jit(functools.partial(logits_head, num_classes=NUM_CLASSES))

    y_conv = jax.block_until_ready(
        conv_fn(x, params["w2_pad"], params["scale_pad"], params["bias_pad"]))
    y_logits = jax.block_until_ready(
        head_fn(feat, params["wt_pad"], params["bt_pad"]))

    # --- pure-JAX references for sanity ---------------------------------------
    ref_conv = jax.lax.conv_general_dilated(
        x, w_conv, window_strides=(2, 2), padding="VALID",
        dimension_numbers=("NCHW", "OIHW", "NCHW"),
        precision=jax.lax.Precision.HIGHEST,
    ) * bn_scale[None, :, None, None] + bn_bias[None, :, None, None]

    pooled_ref = jnp.mean(jnp.maximum(feat, 0.0), axis=(2, 3))   # (N, 4320)
    ref_logits = jnp.einsum("nc,kc->nk", pooled_ref, w_fc,
                            precision=jax.lax.Precision.HIGHEST) + b_fc[None, :]

    assert y_conv.shape == (N, 96, 7, 7)
    assert y_logits.shape == (N, NUM_CLASSES)
    assert jnp.allclose(y_conv, ref_conv, rtol=2e-2, atol=2e-2)
    assert jnp.allclose(y_logits, ref_logits, rtol=2e-2, atol=2e-2)

    print("KERNEL_OK")
</pallas_src>

<mosaic_0001>
module attributes {stable_mosaic.version = 11 : i64} {
  func.func @conv_bn_kernel(%arg0: memref<98x27xf32, #tpu.memory_space<vmem>>, %arg1: memref<27x128xf32, #tpu.memory_space<vmem>>, %arg2: memref<1x128xf32, #tpu.memory_space<vmem>>, %arg3: memref<1x128xf32, #tpu.memory_space<vmem>>, %arg4: memref<98x128xf32, #tpu.memory_space<vmem>>) attributes {dimension_semantics = [], scalar_prefetch = 0 : i64, scratch_operands = 0 : i64, tpu.core_type = #tpu.core_type<tc>} {
    %c0 = arith.constant 0 : index
    %c0_0 = arith.constant 0 : index
    %0 = vector.load %arg0[%c0, %c0_0] : memref<98x27xf32, #tpu.memory_space<vmem>>, vector<98x27xf32>
    %c0_1 = arith.constant 0 : index
    %c0_2 = arith.constant 0 : index
    %1 = vector.load %arg1[%c0_1, %c0_2] : memref<27x128xf32, #tpu.memory_space<vmem>>, vector<27x128xf32>
    %cst = arith.constant dense<0.000000e+00> : vector<98x128xf32>
    %2 = tpu.matmul %0, %1, %cst {dimension_numbers = #tpu.dot_dimension_numbers<[1], [0], [0], [1], [0, 0, 1, 1], [], []>} : vector<98x27xf32>, vector<27x128xf32>, vector<98x128xf32> -> vector<98x128xf32>
    %c0_3 = arith.constant 0 : index
    %c0_4 = arith.constant 0 : index
    %3 = vector.load %arg2[%c0_3, %c0_4] : memref<1x128xf32, #tpu.memory_space<vmem>>, vector<1x128xf32>
    %4 = vector.broadcast %3 : vector<1x128xf32> to vector<98x128xf32>
    %5 = arith.mulf %2, %4 : vector<98x128xf32>
    %c0_5 = arith.constant 0 : index
    %c0_6 = arith.constant 0 : index
    %6 = vector.load %arg3[%c0_5, %c0_6] : memref<1x128xf32, #tpu.memory_space<vmem>>, vector<1x128xf32>
    %7 = vector.broadcast %6 : vector<1x128xf32> to vector<98x128xf32>
    %8 = arith.addf %5, %7 : vector<98x128xf32>
    %c0_7 = arith.constant 0 : index
    %c0_8 = arith.constant 0 : index
    %9 = vector.load %arg4[%c0_7, %c0_8] : memref<98x128xf32, #tpu.memory_space<vmem>>, vector<98x128xf32>
    tpu.vector_store %arg4[%c0_7, %c0_8], %8 {strides = array<i32>} : memref<98x128xf32, #tpu.memory_space<vmem>>, vector<98x128xf32>,
    return
  }
}

</mosaic_0001>

<bundles_post_ra>
// kernel: conv0_bn.1
= control target key start
LH: loop header
LB: loop body
LE: loop exit
PB: predicated region body
PF: predicated region fallthrough
CT: control target
= control target key end

     0   :  { %vm74_vm0 = vcmask 1042432   ;;  %vm34_vm1 = vcmask 220160   ;;  %s347_s1 = inlined_call_operand.vmem [shape: f32[27,128], index: 1, kind: input, shape index: {}]   ;;  %s348_s0 = inlined_call_operand.vmem [shape: f32[98,27], index: 0, kind: input, shape index: {}]   ;;  %s349_s2 = inlined_call_operand.vmem [shape: f32[1,128], index: 2, kind: input, shape index: {}]   ;;  %s350_s3 = inlined_call_operand.vmem [shape: f32[1,128], index: 3, kind: input, shape index: {}]   ;;  %s351_s4 = inlined_call_operand.vmem [shape: f32[98,128], index: 4, kind: output, shape index: {}]  }
   0x1   :  { %v33_v0 = vld [vmem:[%s347_s1 + $0x18] sm:$0x7]  ;;  %v32_v1 = vld [vmem:[%s347_s1 + $0x10] sm:$0xff]  ;;  %v31_v2 = vld [vmem:[%s347_s1 + $0x8] sm:$0xff] }
   0x2   :  { %200 = vmatpush.msk.msra.mxu2 %vm74_vm0, %v33_v0  ;;  %201 = vmatpush.msk.msra.mxu3 %vm74_vm0, %v33_v0  ;;  %v30_v3 = vld [vmem:[%s347_s1] sm:$0xff]  ;;  %v23_v4 = vld [vmem:[%s348_s0 + $0x30] sm:$0xff]  ;;  %v20_v7 = vld [vmem:[%s348_s0 + $0x18] sm:$0xff] }
   0x3   :  { %185 = vmatpush.msk.msra.mxu0 %vm74_vm0, %v33_v0  ;;  %199 = vmatpush.msk.msra.mxu1 %vm74_vm0, %v33_v0  ;;  %v27_v5 = vld [vmem:[%s348_s0 + $0x50] sm:$0xff]  ;;  %v17_v6 = vld [vmem:[%s348_s0] sm:$0xff]  ;;  %v24_v8 = vld [vmem:[%s348_s0 + $0x38] sm:$0xff] }
   0x4   :  { %203 = vmatpush.msra.mxu2 %v32_v1  ;;  %204 = vmatpush.msra.mxu3 %v32_v1  ;;  %v28_v9 = vld [vmem:[%s348_s0 + $0x58] sm:$0xff]  ;;  %v18_v10 = vld [vmem:[%s348_s0 + $0x8] sm:$0xff]  ;;  %v21_v11 = vld [vmem:[%s348_s0 + $0x20] sm:$0xff] }
   0x5   :  { %91 = vmatpush.msra.mxu0 %v32_v1  ;;  %202 = vmatpush.msra.mxu1 %v32_v1  ;;  %v25_v12 = vld [vmem:[%s348_s0 + $0x40] sm:$0xff]  ;;  %v19_v14 = vld [vmem:[%s348_s0 + $0x10] sm:$0xff]  ;;  %v22_v15 = vld [vmem:[%s348_s0 + $0x28] sm:$0xff] }
   0x6   :  { %206 = vmatpush.msra.mxu2 %v31_v2  ;;  %207 = vmatpush.msra.mxu3 %v31_v2  ;;  %v29_v13 = vld [vmem:[%s348_s0 + $0x60] sm:$0x3]  ;;  %v26_v16 = vld [vmem:[%s348_s0 + $0x48] sm:$0xff] }
   0x7   :  { %92 = vmatpush.msra.mxu0 %v31_v2  ;;  %205 = vmatpush.msra.mxu1 %v31_v2  ;;  %v211_v17 = vld [vmem:[%s349_s2] ss:$0 sm:$0xff] }
   0x8   :  { %209 = vmatpush.msra.mxu2 %v30_v3  ;;  %210 = vmatpush.msra.mxu3 %v30_v3  ;;  %v212_v20 = vld [vmem:[%s350_s3] ss:$0 sm:$0xff] }
   0x9   :  { %192 = vmatmul.msk.f32.vlgmr.msra.gmra.mxu2 %vm34_vm1, %v23_v4  ;;  %196 = vmatmul.msk.f32.vlgmr.msra.gmra.mxu3 %vm34_vm1, %v27_v5 }
   0xa   :  { %93 = vmatpush.msra.mxu0 %v30_v3  ;;  %208 = vmatpush.msra.mxu1 %v30_v3 }
   0xb   :  { %186 = vmatmul.msk.f32.vlgmr.msra.gmra.mxu0 %vm34_vm1, %v17_v6  ;;  %189 = vmatmul.msk.f32.vlgmr.msra.gmra.mxu1 %vm34_vm1, %v20_v7 }
  0x11   :  { %193 = vmatmul.msk.f32.gmra.mxu2 %vm34_vm1, %v24_v8  ;;  %197 = vmatmul.msk.f32.gmra.mxu3 %vm34_vm1, %v28_v9 }
  0x13   :  { %187 = vmatmul.msk.f32.gmra.mxu0 %vm34_vm1, %v18_v10  ;;  %190 = vmatmul.msk.f32.gmra.mxu1 %vm34_vm1, %v21_v11 }
  0x19   :  { %194 = vmatmul.msk.f32.gmra.mxu2 %vm34_vm1, %v25_v12  ;;  %198 = vmatmul.msk.f32.gmra.mxu3 %vm34_vm1, %v29_v13 }
  0x1b   :  { %188 = vmatmul.msk.f32.gmra.mxu0 %vm34_vm1, %v19_v14  ;;  %191 = vmatmul.msk.f32.gmra.mxu1 %vm34_vm1, %v22_v15 }
  0x21   :  { %195 = vmatmul.msk.f32.gmra.mxu2 %vm34_vm1, %v26_v16 }
  0x88   :  { %v95_v18 = vpop.f32.mrf.mxu0  ;;  %v104_v19 = vpop.f32.mrf.mxu1 }
  0x89   :  { %v138_v21 = vmul.f32 %v211_v17, %v95_v18  ;;  %v141_v22 = vmul.f32 %v211_v17, %v104_v19 }
  0x8b   :  { %v155_v23 = vadd.f32 %v212_v20, %v138_v21  ;;  %v158_v24 = vadd.f32 %v212_v20, %v141_v22 }
  0x8c   :  { %v113_v25 = vpop.f32.mrf.mxu2  ;;  %v125_v26 = vpop.f32.mrf.mxu3 }
  0x8d   :  { %v144_v27 = vmul.f32 %v211_v17, %v113_v25  ;;  %168 = vst [vmem:[%s351_s4] sm:$0xff] %v155_v23  ;;  %v148_v28 = vmul.f32 %v211_v17, %v125_v26 }
  0x8e   :  { %171 = vst [vmem:[%s351_s4 + $0x18] sm:$0xff] %v158_v24 }
  0x8f   :  { %v161_v29 = vadd.f32 %v212_v20, %v144_v27  ;;  %v165_v30 = vadd.f32 %v212_v20, %v148_v28 }
  0x90   :  { %v98_v31 = vpop.f32.mrf.mxu0  ;;  %v107_v32 = vpop.f32.mrf.mxu1 }
  0x91   :  { %174 = vst [vmem:[%s351_s4 + $0x30] sm:$0xff] %v161_v29  ;;  %v139_v33 = vmul.f32 %v211_v17, %v98_v31  ;;  %v142_v34 = vmul.f32 %v211_v17, %v107_v32 }
  0x92   :  { %178 = vst [vmem:[%s351_s4 + $0x50] sm:$0xff] %v165_v30 }
  0x93   :  { %v156_v35 = vadd.f32 %v212_v20, %v139_v33  ;;  %v159_v36 = vadd.f32 %v212_v20, %v142_v34 }
  0x94   :  { %v116_v37 = vpop.f32.mrf.mxu2  ;;  %v128_v38 = vpop.f32.mrf.mxu3 }
  0x95   :  { %v145_v39 = vmul.f32 %v211_v17, %v116_v37  ;;  %169 = vst [vmem:[%s351_s4 + $0x8] sm:$0xff] %v156_v35  ;;  %v149_v40 = vmul.f32 %v211_v17, %v128_v38 }
  0x96   :  { %172 = vst [vmem:[%s351_s4 + $0x20] sm:$0xff] %v159_v36 }
  0x97   :  { %v162_v41 = vadd.f32 %v212_v20, %v145_v39  ;;  %v166_v42 = vadd.f32 %v212_v20, %v149_v40 }
  0x98   :  { %v101_v43 = vpop.f32.mrf.mxu0  ;;  %v110_v44 = vpop.f32.mrf.mxu1 }
  0x99   :  { %175 = vst [vmem:[%s351_s4 + $0x38] sm:$0xff] %v162_v41  ;;  %v140_v45 = vmul.f32 %v211_v17, %v101_v43  ;;  %v143_v46 = vmul.f32 %v211_v17, %v110_v44 }
  0x9a   :  { %179 = vst [vmem:[%s351_s4 + $0x58] sm:$0xff] %v166_v42 }
  0x9b   :  { %v157_v47 = vadd.f32 %v212_v20, %v140_v45  ;;  %v160_v48 = vadd.f32 %v212_v20, %v143_v46 }
  0x9c   :  { %v119_v49 = vpop.f32.mrf.mxu2  ;;  %v131_v50 = vpop.f32.mrf.mxu3 }
  0x9d   :  { %v146_v51 = vmul.f32 %v211_v17, %v119_v49  ;;  %170 = vst [vmem:[%s351_s4 + $0x10] sm:$0xff] %v157_v47  ;;  %v150_v52 = vmul.f32 %v211_v17, %v131_v50 }
  0x9e   :  { %173 = vst [vmem:[%s351_s4 + $0x28] sm:$0xff] %v160_v48 }
  0x9f   :  { %v163_v53 = vadd.f32 %v212_v20, %v146_v51  ;;  %v167_v54 = vadd.f32 %v212_v20, %v150_v52 }
  0xa1   :  { %176 = vst [vmem:[%s351_s4 + $0x40] sm:$0xff] %v163_v53 }
  0xa2   :  { %180 = vst [vmem:[%s351_s4 + $0x60] sm:$0x3] %v167_v54 }
  0xa4   :  { %v122_v55 = vpop.f32.mrf.mxu2 }
  0xa5   :  { %v147_v56 = vmul.f32 %v211_v17, %v122_v55 }
  0xa7   :  { %v164_v57 = vadd.f32 %v212_v20, %v147_v56 }
  0xa9   :  { %177 = vst [vmem:[%s351_s4 + $0x48] sm:$0xff] %v164_v57 }

</bundles_post_ra>
